<compile_context>
chip_gen: v6e
topology: v6e:2x2x1
jax: 0.10.0
libtpu: 0.0.40
codegen_flags: <defaults>
</compile_context>

<pallas_src>
import functools

import jax
import jax.numpy as jnp
from jax.experimental import pallas as pl
from jax.experimental.pallas import tpu as pltpu


def _mlp_kernel(x_ref, w1_ref, b1_ref, w23_ref, b23_ref, o_ref):
    # x tile: (5, bt) -- in_features on sublanes, batch on the 128-lane axis.
    # net1: h1 = relu(W1 @ X + b1)                               (10, bt)
    h1 = jnp.dot(w1_ref[...], x_ref[...], preferred_element_type=jnp.float32)
    h1 = jnp.maximum(h1 + b1_ref[...], 0.0)                      # (10,bt)+(10,1)
    # net3(net2(.)) folded into one affine map: W23 @ h1 + b23   (1, bt)
    out = jnp.dot(w23_ref[...], h1, preferred_element_type=jnp.float32)
    o_ref[...] = (out + b23_ref[...]).astype(o_ref.dtype)        # lane-dense store


def _round_up(n, m):
    return ((n + m - 1) // m) * m


@functools.partial(jax.jit, static_argnames=("b_tile",))
def uneven_sharded_model_forward(x, params, *, b_tile=65536):
    """x: (B, 5) float32; params: PyTorch-layout weights (out,in), biases (out,).
    Returns (B, 1) float32 = net3(net2(relu(net1(x))))."""
    w1, b1 = params["w1"], params["b1"]          # (10, 5), (10,)
    w2, b2 = params["w2"], params["b2"]          # (15, 10), (15,)
    w3, b3 = params["w3"], params["b3"]          # (1, 15), (1,)

    # Exact algebraic fusion of net2/net3 (no activation between them).
    # Tiny ops; fused / constant-folded under the enclosing jit.
    w23 = w3 @ w2                                # (1, 10)
    b23 = (w3 @ b2 + b3).reshape(1, 1)           # (1, 1)
    b1c = b1.reshape(-1, 1)                      # (10, 1): broadcast over lanes

    B = x.shape[0]
    b128 = _round_up(B, 128)                     # lane alignment (<=127 row pad)

    # Tile choice:
    #  - large enough to amortize ~0.35us fixed cost per grid step,
    #  - capped at b_tile=64K -> ~20 MiB peak VMEM (double-buffered x/out tiles
    #    + (10,bt) f32 h1 temp), inside the 32 MiB limit requested below on
    #    every generation (v5e/v6e/v7x),
    #  - at large B keep >= ~4 grid steps so the "parallel" batch axis can be
    #    split across v7x's two TensorCores.
    bt = max(128, _round_up(pl.cdiv(b128, 4), 128))
    bt = min(bt, b_tile, b128)
    grid = (pl.cdiv(b128, bt),)

    # Feature-major relayout: (B,5) -> (5, b128). Under jit this is one fused
    # copy; keeping the kernel layout (5, bt) keeps x/out VMEM tiles lane-dense
    # (32 B per batch element instead of 512 B for a (bt,5) block).
    x_t = x.T
    if b128 != B:
        x_t = jnp.pad(x_t, ((0, 0), (0, b128 - B)))

    # Weights/biases: full-array blocks with a constant index_map -> resident in
    # VMEM while x is streamed and double-buffered by the Pallas pipeliner.
    const = lambda a: pl.BlockSpec(a.shape, lambda i: (0,) * a.ndim)

    out_t = pl.pallas_call(
        _mlp_kernel,
        out_shape=jax.ShapeDtypeStruct((1, b128), jnp.float32),
        grid=grid,
        in_specs=[
            pl.BlockSpec((5, bt), lambda i: (0, i)),        # x: streamed tiles
            const(w1), const(b1c), const(w23), const(b23),  # resident weights
        ],
        out_specs=pl.BlockSpec((1, bt), lambda i: (0, i)),  # lane-dense output
        compiler_params=pltpu.CompilerParams(
            dimension_semantics=("parallel",),   # shard batch over v7x's 2 TCs
            vmem_limit_bytes=32 * 1024 * 1024,   # > v5e 16 MiB scoped default,
                                                 # < v7x 64 MiB physical VMEM
        ),
    )(x_t, w1, b1c, w23, b23)

    # (1, b128) -> (B, 1): slice off lane padding + copy-free reshape (no .T).
    return out_t[0, :B].reshape(B, 1)


def init_params(key):
    """torch.nn.Linear-style init (U(-1/sqrt(fan_in), 1/sqrt(fan_in))); weights
    stored PyTorch-style as (out_features, in_features)."""
    def linear(key, fan_in, fan_out):
        kw, kb = jax.random.split(key)
        bound = 1.0 / (fan_in ** 0.5)
        w = jax.random.uniform(kw, (fan_out, fan_in), jnp.float32, -bound, bound)
        b = jax.random.uniform(kb, (fan_out,), jnp.float32, -bound, bound)
        return w, b

    k1, k2, k3 = jax.random.split(key, 3)
    w1, b1 = linear(k1, 5, 10)     # net1
    w2, b2 = linear(k2, 10, 15)    # net2
    w3, b3 = linear(k3, 15, 1)     # net3
    return {"w1": w1, "b1": b1, "w2": w2, "b2": b2, "w3": w3, "b3": b3}


def _reference_forward(x, params):
    # Pure-JAX unfused reference (same math as the PyTorch module).
    h = jnp.maximum(x @ params["w1"].T + params["b1"], 0.0)
    h = h @ params["w2"].T + params["b2"]
    return h @ params["w3"].T + params["b3"]


if __name__ == "__main__":
    key = jax.random.PRNGKey(0)
    k_params, k_x1, k_x2 = jax.random.split(key, 3)
    params = init_params(k_params)

    # Small batch (single grid step, clipped/padded edge tile).
    x_small = jax.random.normal(k_x1, (8, 5), jnp.float32)
    out_small = jax.block_until_ready(uneven_sharded_model_forward(x_small, params))
    ref_small = _reference_forward(x_small, params)
    assert out_small.shape == (8, 1)
    assert jnp.allclose(out_small, ref_small, atol=1e-5, rtol=1e-5)

    # Batch that is not a multiple of 128 and spans multiple grid steps,
    # exercising the index_map and the clipped edge tile (per review).
    x_big = jax.random.normal(k_x2, (300, 5), jnp.float32)
    out_big = jax.block_until_ready(uneven_sharded_model_forward(x_big, params))
    ref_big = _reference_forward(x_big, params)
    assert out_big.shape == (300, 1)
    assert jnp.allclose(out_big, ref_big, atol=1e-5, rtol=1e-5)

    print("KERNEL_OK")
</pallas_src>

<mosaic_0001>
module attributes {stable_mosaic.version = 11 : i64} {
  func.func @_mlp_kernel(%arg0: i32, %arg1: memref<5x128xf32, #tpu.memory_space<vmem>>, %arg2: memref<10x5xf32, #tpu.memory_space<vmem>>, %arg3: memref<10x1xf32, #tpu.memory_space<vmem>>, %arg4: memref<1x10xf32, #tpu.memory_space<vmem>>, %arg5: memref<1x1xf32, #tpu.memory_space<vmem>>, %arg6: memref<1x128xf32, #tpu.memory_space<vmem>>) attributes {dimension_semantics = [#tpu.dimension_semantics<parallel>], iteration_bounds = array<i64: 1>, scalar_prefetch = 0 : i64, scratch_operands = 0 : i64, tpu.core_type = #tpu.core_type<tc>, window_params = [{transform_indices = @transform_0, window_bounds = array<i64: 5, 128>}, {pipeline_mode = #tpu.pipeline_mode<synchronous>, transform_indices = @transform_1, window_bounds = array<i64: 10, 5>}, {pipeline_mode = #tpu.pipeline_mode<synchronous>, transform_indices = @transform_2, window_bounds = array<i64: 10, 1>}, {pipeline_mode = #tpu.pipeline_mode<synchronous>, transform_indices = @transform_3, window_bounds = array<i64: 1, 10>}, {pipeline_mode = #tpu.pipeline_mode<synchronous>, transform_indices = @transform_4, window_bounds = array<i64: 1, 1>}, {transform_indices = @transform_5, window_bounds = array<i64: 1, 128>}]} {
    %c0 = arith.constant 0 : index
    %c0_0 = arith.constant 0 : index
    %0 = vector.load %arg2[%c0, %c0_0] : memref<10x5xf32, #tpu.memory_space<vmem>>, vector<10x5xf32>
    %c0_1 = arith.constant 0 : index
    %c0_2 = arith.constant 0 : index
    %1 = vector.load %arg1[%c0_1, %c0_2] : memref<5x128xf32, #tpu.memory_space<vmem>>, vector<5x128xf32>
    %cst = arith.constant dense<0.000000e+00> : vector<10x128xf32>
    %2 = tpu.matmul %0, %1, %cst {dimension_numbers = #tpu.dot_dimension_numbers<[1], [0], [0], [1], [0, 0, 1, 1], [], []>} : vector<10x5xf32>, vector<5x128xf32>, vector<10x128xf32> -> vector<10x128xf32>
    %c0_3 = arith.constant 0 : index
    %c0_4 = arith.constant 0 : index
    %3 = vector.load %arg3[%c0_3, %c0_4] : memref<10x1xf32, #tpu.memory_space<vmem>>, vector<10x1xf32>
    %4 = vector.broadcast %3 : vector<10x1xf32> to vector<10x128xf32>
    %5 = arith.addf %2, %4 : vector<10x128xf32>
    %cst_5 = arith.constant 0.000000e+00 : f32
    %6 = vector.broadcast %cst_5 : f32 to vector<10x128xf32>
    %7 = arith.maximumf %5, %6 : vector<10x128xf32>
    %c0_6 = arith.constant 0 : index
    %c0_7 = arith.constant 0 : index
    %8 = vector.load %arg4[%c0_6, %c0_7] : memref<1x10xf32, #tpu.memory_space<vmem>>, vector<1x10xf32>
    %cst_8 = arith.constant dense<0.000000e+00> : vector<1x128xf32>
    %9 = tpu.matmul %8, %7, %cst_8 {dimension_numbers = #tpu.dot_dimension_numbers<[1], [0], [0], [1], [0, 0, 1, 1], [], []>} : vector<1x10xf32>, vector<10x128xf32>, vector<1x128xf32> -> vector<1x128xf32>
    %c0_9 = arith.constant 0 : index
    %c0_10 = arith.constant 0 : index
    %10 = vector.load %arg5[%c0_9, %c0_10] : memref<1x1xf32, #tpu.memory_space<vmem>>, vector<1x1xf32>
    %11 = vector.broadcast %10 : vector<1x1xf32> to vector<1x128xf32>
    %12 = arith.addf %9, %11 : vector<1x128xf32>
    %c0_11 = arith.constant 0 : index
    %c0_12 = arith.constant 0 : index
    %13 = vector.load %arg6[%c0_11, %c0_12] : memref<1x128xf32, #tpu.memory_space<vmem>>, vector<1x128xf32>
    tpu.vector_store %arg6[%c0_11, %c0_12], %12 {strides = array<i32>} : memref<1x128xf32, #tpu.memory_space<vmem>>, vector<1x128xf32>,
    return
  }
  func.func @transform_0(%arg0: i32) -> (i32, i32) {
    %c0_i32 = arith.constant 0 : i32
    %c0_i32_0 = arith.constant 0 : i32
    return %c0_i32, %arg0 : i32, i32
  }
  func.func @transform_1(%arg0: i32) -> (i32, i32) {
    %c0_i32 = arith.constant 0 : i32
    %c0_i32_0 = arith.constant 0 : i32
    %c0_i32_1 = arith.constant 0 : i32
    return %c0_i32, %c0_i32_0 : i32, i32
  }
  func.func @transform_2(%arg0: i32) -> (i32, i32) {
    %c0_i32 = arith.constant 0 : i32
    %c0_i32_0 = arith.constant 0 : i32
    %c0_i32_1 = arith.constant 0 : i32
    return %c0_i32, %c0_i32_0 : i32, i32
  }
  func.func @transform_3(%arg0: i32) -> (i32, i32) {
    %c0_i32 = arith.constant 0 : i32
    %c0_i32_0 = arith.constant 0 : i32
    %c0_i32_1 = arith.constant 0 : i32
    return %c0_i32, %c0_i32_0 : i32, i32
  }
  func.func @transform_4(%arg0: i32) -> (i32, i32) {
    %c0_i32 = arith.constant 0 : i32
    %c0_i32_0 = arith.constant 0 : i32
    %c0_i32_1 = arith.constant 0 : i32
    return %c0_i32, %c0_i32_0 : i32, i32
  }
  func.func @transform_5(%arg0: i32) -> (i32, i32) {
    %c0_i32 = arith.constant 0 : i32
    %c0_i32_0 = arith.constant 0 : i32
    return %c0_i32, %arg0 : i32, i32
  }
}

</mosaic_0001>

<bundles_post_ra>
// kernel: uneven_sharded_model_forward.1
= control target key start
LH: loop header
LB: loop body
LE: loop exit
PB: predicated region body
PF: predicated region fallthrough
CT: control target
= control target key end

     0   :  { %vm44_vm0 = vcmask 1044480   ;;  %vm37_vm1 = vcmask 39936   ;;  %v247_v3 = vmov 0   ;;  %v248_v6 = vmov 0.0   ;;  %s304_s0 = inlined_call_operand.vmem [shape: f32[5,128], index: 0, kind: input, shape index: {}]   ;;  %s305_s1 = inlined_call_operand.vmem [shape: f32[10,5], index: 1, kind: input, shape index: {}]   ;;  %s306_s2 = inlined_call_operand.vmem [shape: f32[10,1], index: 2, kind: input, shape index: {}]   ;;  %s307_s4 = inlined_call_operand.<no memory space> [shape: f32[1,1], index: 4, kind: input, shape index: {}]   ;;  %s308_s3 = inlined_call_operand.vmem [shape: f32[1,10], index: 3, kind: input, shape index: {}]   ;;  %s309_s5 = inlined_call_operand.vmem [shape: f32[1,128], index: 5, kind: output, shape index: {}]  }
   0x1   :  { %v24_v0 = vld [vmem:[%s304_s0] sm:$0x1f]  ;;  %v23_v2 = vld [vmem:[%s305_s1 + $0x8] sm:$0x3]  ;;  %245 = vset.pattern.permute.xlu0 %v247_v3  ;;  %246 = vset.pattern.permute.xlu1 %v247_v3  ;;  %vm249_vm2 = vmmov 0   ;;  %v10_v7 = vstv %s307_s4  ;;  %vm140_vm3 = vcmask 1041408   ;;  %v132_v18 = vlaneseq }
   0x2   :  { %v22_v1 = vld [vmem:[%s305_s1] sm:$0xff]  ;;  %230 = vmatprep.subr.msk.mxu0 %vm44_vm0, %v24_v0  ;;  %v26_v4 = vld [vmem:[%s306_s2 + $0x8] sm:$0x3]  ;;  %235 = vmatprep.subr.mxu1 %v248_v6  ;;  %11 = vst [vmem:[#allocation2] sm:$0x1] %v10_v7  ;;  %vm136_vm4 = vcmask 80896  }
   0x3   :  { %232 = vmatprep.mubr.msk.f32.mxu0 %vm37_vm1, %v22_v1  ;;  %231 = vmatpush3.msk.msra.mxu0 %vm44_vm0, %v24_v0  ;;  %v25_v5 = vld [vmem:[%s306_s2] sm:$0xff]  ;;  %v133_v19 = vshrl.u32 %v132_v18, 7 }
   0x4   :  { %34 = vperm.xlu0 %245, %v26_v4   ;;  %233 = vmatmul.mubr.msk.f32.vlgmr.msra.gmra.mxu0 %vm37_vm1, %v23_v2  ;;  %v125_v17 = vld [vmem:[%s308_s3] sm:$0x1] }
   0x5   :  { %239 = vmatprep.mubr.msk.f32.mxu1 %vm249_vm2, %v248_v6  ;;  %v134_v20 = vsub.s32 0, %v133_v19 }
   0x8   :  { %29 = vperm.xlu0 %245, %v25_v5  }
   0x9   :  { %v126_v8 = vld [vmem:[#allocation2] sm:$0x1] }
   0xa   :  { %129 = vperm.xlu1 %246, %v126_v8  }
  0x7f   :  { %v35_v9 = vpop.permute.xlu0 %34 }
  0x83   :  { %v30_v12 = vpop.permute.xlu0 %29 }
  0x85   :  { %v130_v21 = vpop.permute.xlu1 %129 }
  0x86   :  { %v135_v22 = vrot.slane %v130_v21, %v134_v20 }
  0xc4   :  { %v234_v10 = vpop.f32.mrf.mxu0 }
  0xc5   :  { %v120_v11 = vadd.f32 %v234_v10, %v35_v9 }
  0xc6   :  { %v114_v13 = vpop.f32.mrf.mxu0 }
  0xc7   :  { %v124_v14 = vmax.f32 %v120_v11, 0.0  ;;  %v115_v15 = vadd.f32 %v114_v13, %v30_v12 }
  0xc9   :  { %v123_v16 = vmax.f32 %v115_v15, 0.0  ;;  %236 = vmatpush3.msk.msra.mxu1 %vm140_vm3, %v124_v14 }
  0xca   :  { %237 = vmatprep.subr.mxu1 %v248_v6 }
  0xcb   :  { %238 = vmatpush3.msra.mxu1 %v123_v16 }
  0xcc   :  { %240 = vmatmul.mubr.msk.f32.vlgmr.msra.gmra.mxu1 %vm136_vm4, %v125_v17 }
 0x18c   :  { %v210_v23 = vpop.f32.mrf.mxu1 }
 0x18d   :  { %v211_v24 = vadd.f32 %v210_v23, %v135_v22 }
 0x18e   :  { %v241_v25 = vpop.f32.mrf.mxu1 }
 0x18f   :  { %214 = vst [vmem:[%s309_s5] sm:$0x1] %v211_v24 }

</bundles_post_ra>
